<compile_context>
chip_gen: v7x
topology: tpu7x:2x2x1
jax: 0.10.0
libtpu: 0.0.40
codegen_flags: <defaults>
</compile_context>

<pallas_src>
import math

import jax
import jax.numpy as jnp
from jax.experimental import pallas as pl
from jax.experimental.pallas import tpu as pltpu


def _round_up(a, m):
    return ((a + m - 1) // m) * m


def _prediction_kernel(x_ref, w_ref, b_ref, o_ref):
    # x_ref: (TB, Dp)  last-frame activations (compute dtype)
    # w_ref: (Dp, TN)  pre-transposed weight slab, (K, N) layout (compute dtype)
    # b_ref: (1, TN)   bias (f32)
    # o_ref: (TB, TN)  f32 output
    y = jnp.dot(x_ref[...], w_ref[...], preferred_element_type=jnp.float32)
    o_ref[...] = jnp.maximum(y + b_ref[...], 0.0)


def prepare_prediction_params(weight, bias, compute_dtype=jnp.float32):
    """One-time parameter prep (hoist/cache across calls for serving).

    weight: (D, D) in PyTorch nn.Linear (out, in) layout; bias: (D,).
    Returns weight transposed to (in, out) = (K, N) and zero-padded so the
    feature dim is a lane-dense multiple of 128, plus a (1, Dp) f32 bias.
    """
    D_out, D_in = weight.shape
    Dp = _round_up(D_in, 128)
    w_t = weight.T                                  # (K, N)
    if Dp != D_in:
        w_t = jnp.pad(w_t, ((0, Dp - D_in), (0, Dp - D_out)))
        b = jnp.pad(bias, (0, Dp - D_out))
    else:
        b = bias
    return w_t.astype(compute_dtype), b.astype(jnp.float32).reshape(1, Dp)


def prediction_layer_prepared(x, w_t, b2, *, compute_dtype=jnp.float32, tb_max=512):
    """x: (B, S, D); w_t: (Dp, Dp) pre-transposed/padded weight; b2: (1, Dp)."""
    B, S, D = x.shape
    Dp = w_t.shape[0]
    isz = jnp.dtype(compute_dtype).itemsize

    # Only the last frame is ever used — a single strided read of B*D elements.
    # (A 3-D last-frame BlockSpec would avoid even this, but a size-1 sublane
    # block on the seq axis is layout-fragile; the slice is cheap and robust.)
    x_last = x[:, S - 1, :]
    if Dp != D:
        # Contraction-dim padding must be zeros (weight rows are also zero).
        x_last = jnp.pad(x_last, ((0, 0), (0, Dp - D)))
    x_last = x_last.astype(compute_dtype)

    # Batch tile: multiple of 8, aiming for >= ~8 grid steps so double-buffering
    # and both v7x TensorCores stay busy.  N tile: 256 fills the 2x256x256 MXU
    # on v6e/v7x (128 fallback when Dp is not a multiple of 256).
    TB = min(tb_max, max(8, _round_up(pl.cdiv(B, 8), 8)))
    TN = 256 if Dp % 256 == 0 else 128

    def vmem_need(tb, tn):  # double-buffered x / weight / out / bias tiles
        return 2 * (tb * Dp * isz + Dp * tn * isz + tb * tn * 4 + tn * 4)

    budget = 40 * 1024 * 1024  # v7x-safe (64 MiB physical per TensorCore)
    while vmem_need(TB, TN) > budget and TN > 128:
        TN //= 2
    while vmem_need(TB, TN) > budget and TB > 8:
        TB = max(8, (TB // 2) // 8 * 8)

    grid = (pl.cdiv(B, TB), Dp // TN)  # batch outer, N inner (x tile resident)

    cost = pl.CostEstimate(
        flops=2 * B * Dp * Dp,
        bytes_accessed=B * Dp * isz + Dp * Dp * isz + Dp * 4 + B * Dp * 4,
        transcendentals=0,
    )

    out = pl.pallas_call(
        _prediction_kernel,
        out_shape=jax.ShapeDtypeStruct((B, Dp), jnp.float32),
        grid=grid,
        in_specs=[
            pl.BlockSpec((TB, Dp), lambda i, j: (i, 0)),   # x tile, resident across j
            pl.BlockSpec((Dp, TN), lambda i, j: (0, j)),   # weight slab (K, N)
            pl.BlockSpec((1, TN), lambda i, j: (0, j)),    # bias slab
        ],
        out_specs=pl.BlockSpec((TB, TN), lambda i, j: (i, j)),
        compiler_params=pltpu.CompilerParams(
            dimension_semantics=("parallel", "parallel"),
            vmem_limit_bytes=int(min(max(2 * vmem_need(TB, TN), 16 << 20), 48 << 20)),
        ),
        cost_estimate=cost,
    )(x_last, w_t, b2)

    # Ragged batch rows are masked on store; only the padded feature columns
    # (if any) need trimming.
    return out if Dp == D else out[:, :D]


def prediction_layer(x, weight, bias, *, compute_dtype=jnp.float32, allow_xla_fallback=True):
    """Forward pass of PredictionLayer: relu(x[:, -1, :] @ weight.T + bias)."""
    B, S, D = x.shape
    if allow_xla_fallback and B * D * D < (1 << 21):
        # Tiny problem: a fused XLA dot is as fast as a kernel launch.
        return jnp.maximum(jnp.dot(x[:, S - 1, :], weight.T) + bias, 0.0)
    w_t, b2 = prepare_prediction_params(weight, bias, compute_dtype)
    return prediction_layer_prepared(x, w_t, b2, compute_dtype=compute_dtype)


def reference(x, weight, bias):
    y = jnp.matmul(x[:, -1, :], weight.T, precision=jax.lax.Precision.HIGHEST)
    return jnp.maximum(y + bias, 0.0)


def _make_inputs(key, B, S, D):
    kx, kw, kb = jax.random.split(key, 3)
    x = jax.random.normal(kx, (B, S, D), dtype=jnp.float32)
    bound = 1.0 / math.sqrt(D)  # nn.Linear-style uniform init bounds
    weight = jax.random.uniform(kw, (D, D), jnp.float32, -bound, bound)
    bias = jax.random.uniform(kb, (D,), jnp.float32, -bound, bound)
    return x, weight, bias


if __name__ == "__main__":
    key = jax.random.PRNGKey(0)
    k1, k2 = jax.random.split(key)

    # --- Test 1: tiny module-spec shape; force the Pallas kernel path. ---
    B, S, D = 2, 8, 32
    x, weight, bias = _make_inputs(k1, B, S, D)
    out = prediction_layer(x, weight, bias, allow_xla_fallback=False)
    out = jax.block_until_ready(out)
    ref = reference(x, weight, bias)
    assert out.shape == (B, D)
    assert jnp.allclose(out, ref, rtol=5e-3, atol=5e-3)

    # XLA-fallback branch (same math, tiny shapes).
    out_fb = jax.block_until_ready(prediction_layer(x, weight, bias))
    assert jnp.allclose(out_fb, ref, rtol=5e-3, atol=5e-3)

    # --- Test 2: ragged batch + N-tiled weight (B not a multiple of TB). ---
    B2, S2, D2 = 10, 4, 512
    x2, w2, b2v = _make_inputs(k2, B2, S2, D2)
    out2 = prediction_layer(x2, w2, b2v, allow_xla_fallback=False)
    out2 = jax.block_until_ready(out2)
    ref2 = reference(x2, w2, b2v)
    assert out2.shape == (B2, D2)
    assert jnp.allclose(out2, ref2, rtol=5e-3, atol=5e-3)

    # --- Test 3: bf16 input path (f32 accumulation + f32 epilogue). ---
    out3 = prediction_layer(x2, w2, b2v, compute_dtype=jnp.bfloat16,
                            allow_xla_fallback=False)
    out3 = jax.block_until_ready(out3)
    assert jnp.allclose(out3, ref2, rtol=3e-2, atol=3e-2)

    print("KERNEL_OK")
</pallas_src>

<mosaic_0001>
module attributes {stable_mosaic.version = 11 : i64} {
  func.func @_prediction_kernel(%arg0: i32, %arg1: i32, %arg2: memref<8x128xf32, #tpu.memory_space<vmem>>, %arg3: memref<128x128xf32, #tpu.memory_space<vmem>>, %arg4: memref<1x128xf32, #tpu.memory_space<vmem>>, %arg5: memref<8x128xf32, #tpu.memory_space<vmem>>) attributes {dimension_semantics = [#tpu.dimension_semantics<parallel>, #tpu.dimension_semantics<parallel>], iteration_bounds = array<i64: 1, 1>, scalar_prefetch = 0 : i64, scratch_operands = 0 : i64, tpu.core_type = #tpu.core_type<tc>, window_params = [{transform_indices = @transform_0, window_bounds = array<i64: 8, 128>}, {transform_indices = @transform_1, window_bounds = array<i64: 128, 128>}, {transform_indices = @transform_2, window_bounds = array<i64: 1, 128>}, {transform_indices = @transform_3, window_bounds = array<i64: 8, 128>}]} {
    %c0 = arith.constant 0 : index
    %c0_0 = arith.constant 0 : index
    %0 = vector.load %arg2[%c0, %c0_0] : memref<8x128xf32, #tpu.memory_space<vmem>>, vector<8x128xf32>
    %c0_1 = arith.constant 0 : index
    %c0_2 = arith.constant 0 : index
    %1 = vector.load %arg3[%c0_1, %c0_2] : memref<128x128xf32, #tpu.memory_space<vmem>>, vector<128x128xf32>
    %cst = arith.constant dense<0.000000e+00> : vector<8x128xf32>
    %2 = tpu.matmul %0, %1, %cst {dimension_numbers = #tpu.dot_dimension_numbers<[1], [0], [0], [1], [0, 0, 1, 1], [], []>} : vector<8x128xf32>, vector<128x128xf32>, vector<8x128xf32> -> vector<8x128xf32>
    %c0_3 = arith.constant 0 : index
    %c0_4 = arith.constant 0 : index
    %3 = vector.load %arg4[%c0_3, %c0_4] : memref<1x128xf32, #tpu.memory_space<vmem>>, vector<1x128xf32>
    %4 = vector.broadcast %3 : vector<1x128xf32> to vector<8x128xf32>
    %5 = arith.addf %2, %4 : vector<8x128xf32>
    %cst_5 = arith.constant 0.000000e+00 : f32
    %6 = vector.broadcast %cst_5 : f32 to vector<8x128xf32>
    %7 = arith.maximumf %5, %6 : vector<8x128xf32>
    %c0_6 = arith.constant 0 : index
    %c0_7 = arith.constant 0 : index
    %8 = vector.load %arg5[%c0_6, %c0_7] : memref<8x128xf32, #tpu.memory_space<vmem>>, vector<8x128xf32>
    tpu.vector_store %arg5[%c0_6, %c0_7], %7 {strides = array<i32>} : memref<8x128xf32, #tpu.memory_space<vmem>>, vector<8x128xf32>,
    return
  }
  func.func @transform_0(%arg0: i32, %arg1: i32) -> (i32, i32) {
    %c0_i32 = arith.constant 0 : i32
    %c0_i32_0 = arith.constant 0 : i32
    return %arg0, %c0_i32 : i32, i32
  }
  func.func @transform_1(%arg0: i32, %arg1: i32) -> (i32, i32) {
    %c0_i32 = arith.constant 0 : i32
    %c0_i32_0 = arith.constant 0 : i32
    return %c0_i32, %arg1 : i32, i32
  }
  func.func @transform_2(%arg0: i32, %arg1: i32) -> (i32, i32) {
    %c0_i32 = arith.constant 0 : i32
    %c0_i32_0 = arith.constant 0 : i32
    return %c0_i32, %arg1 : i32, i32
  }
  func.func @transform_3(%arg0: i32, %arg1: i32) -> (i32, i32) {
    %c0_i32 = arith.constant 0 : i32
    return %arg0, %arg1 : i32, i32
  }
}

</mosaic_0001>

<bundles_post_ra>
// kernel: tpu_custom_call.1
= control target key start
LH: loop header
LB: loop body
LE: loop exit
PB: predicated region body
PF: predicated region fallthrough
CT: control target
= control target key end

     0   :  { %8 = vsyncpa [#allocation3], 0  ;;  %s391_s0 = inlined_call_operand.hbm [shape: f32[2,128], index: 0, kind: input, shape index: {}]   ;;  %s392_s1 = inlined_call_operand.hbm [shape: f32[128,128], index: 1, kind: input, shape index: {}]   ;;  %s393_s2 = inlined_call_operand.vmem [shape: f32[1,128], index: 2, kind: input, shape index: {}]   ;;  %s394_s3 = inlined_call_operand.hbm [shape: f32[2,128], index: 3, kind: output, shape index: {}]  }
   0x1   :  { %9 = vsyncpa [#allocation6], 0 }
   0x2   :  { %10 = vsyncpa [#allocation4], 0 }
   0x3   :  { %15 = vsyncadd [#allocation3], 96  ;;  %s316_s12 = smov [#allocation2]   ;;  %s244_s16 = scalar_lea.hbm %s391_s0, 32 }
   0x4   :  { %s16_s13 = sshll.u32 %s316_s12, 4  ;;  %p245_p0 = scmp.ne.s32.totalorder %s391_s0, %s244_s16  ;;  %s17_s13 = int_to_ptr.vmem [resolvable:$true] %s16_s13 }
   0x5   :  { %p248_p1 = scmp.lt.u32.totalorder %s244_s16, %s391_s0 }
   0x7   :  { %p250_p2 = pnand %p248_p1, %p245_p0 }
   0x9   :  { %253 = shalt.err (!%p250_p2)
}
   0xa   :  { %s254_s21 = scalar_lea.vmem %s17_s13, 32  ;;  %s258_s22 = scalar_lea.vmem %s17_s13, 128 }
   0xb   :  { %p255_p3 = scmp.ne.s32.totalorder %s17_s13, %s254_s21  ;;  %p259_p4 = scmp.lt.s32.totalorder %s17_s13, %s17_s13 }
   0xc   :  { %p260_p5 = scmp.lt.s32.totalorder %s258_s22, %s254_s21 }
   0xe   :  { %p261_p6 = por %p260_p5, %p259_p4 }
  0x10   :  { %p262_p7 = pnand %p261_p6, %p255_p3 }
  0x12   :  { %265 = shalt.err (!%p262_p7)
}
  0x13   :  { %s317_s23 = smov 32   ;;  %s318_s24 = smov 2  }
  0x14   :  { %22 = dma.hbm_to_vmem [thread:$0]  %s391_s0, 32, %s17_s13, [#allocation3], %s317_s23, %s317_s23, %s318_s24  }
  0x15   :  { %s319_s27 = smov [#allocation5]   ;;  %s266_s4 = scalar_lea.hbm %s392_s1, 2048 }
  0x16   :  { %s28_s28 = sshll.u32 %s319_s27, 4  ;;  %p267_p8 = scmp.ne.s32.totalorder %s392_s1, %s266_s4  ;;  %s29_s28 = int_to_ptr.vmem [resolvable:$true] %s28_s28 }
  0x17   :  { %p270_p9 = scmp.lt.u32.totalorder %s266_s4, %s392_s1 }
  0x19   :  { %p272_p10 = pnand %p270_p9, %p267_p8 }
  0x1b   :  { %275 = shalt.err (!%p272_p10)
}
  0x1c   :  { %s276_s9 = scalar_lea.vmem %s29_s28, 2048  ;;  %p281_p12 = scmp.lt.s32.totalorder %s29_s28, %s29_s28 }
  0x1d   :  { %p277_p11 = scmp.ne.s32.totalorder %s29_s28, %s276_s9  ;;  %p282_p13 = scmp.lt.s32.totalorder %s276_s9, %s276_s9 }
  0x1f   :  { %p283_p0 = por %p282_p13, %p281_p12 }
  0x21   :  { %p284_p1 = pnand %p283_p0, %p277_p11 }
  0x23   :  { %287 = shalt.err (!%p284_p1)
}
  0x24   :  { %s320_s0 = smov 128   ;;  %s321_s10 = smov 8  }
  0x25   :  { %34 = dma.hbm_to_vmem [thread:$0]  %s392_s1, 2048, %s29_s28, [#allocation6], %s320_s0, %s320_s0, %s321_s10  }
  0x26   :  { %310 = dma.done.wait [#allocation3], 128  }
  0x27   :  { %311 = vsyncadd [#allocation3], 4294967168 }
  0x28   :  { %312 = dma.done.wait [#allocation6], 2048  }
  0x29   :  { %313 = vsyncadd [#allocation6], 4294965248  ;;  %v322_v0 = vmov 0.0|0.0   ;;  %vm323_vm0 = vmmov 0   ;;  %v324_v1 = vmov 0.0   ;;  %v44_v2 = vld [vmem:[#allocation5] sm:$0xff] }
  0x2a   :  { %210 = vmatprep.subr.bf16.mxu0 %v322_v0  ;;  %207 = vmatprep.mubr.msk.f32.mxu0 %vm323_vm0, %v324_v1  ;;  %v45_v3 = vld [vmem:[#allocation5 + $0x8] sm:$0xff]  ;;  %v46_v4 = vld [vmem:[#allocation5 + $0x10] sm:$0xff]  ;;  %v47_v6 = vld [vmem:[#allocation5 + $0x18] sm:$0xff] }
  0x2b   :  { %v211_v5 = vpack.c.bf16 %v45_v3, %v44_v2  ;;  %v214_v7 = vpack.c.bf16 %v47_v6, %v46_v4  ;;  %v48_v8 = vld [vmem:[#allocation5 + $0x20] sm:$0xff]  ;;  %v49_v9 = vld [vmem:[#allocation5 + $0x28] sm:$0xff]  ;;  %v50_v11 = vld [vmem:[#allocation5 + $0x30] sm:$0xff] }
  0x2c   :  { %v217_v10 = vpack.c.bf16 %v49_v9, %v48_v8  ;;  %v51_v12 = vld [vmem:[#allocation5 + $0x38] sm:$0xff]  ;;  %v52_v14 = vld [vmem:[#allocation5 + $0x40] sm:$0xff]  ;;  %v53_v15 = vld [vmem:[#allocation5 + $0x48] sm:$0xff] }
  0x2d   :  { %212 = vmatpush3.bf16.msra.mxu0 %v211_v5  ;;  %v220_v13 = vpack.c.bf16 %v51_v12, %v50_v11  ;;  %v223_v16 = vpack.c.bf16 %v53_v15, %v52_v14  ;;  %v54_v17 = vld [vmem:[#allocation5 + $0x50] sm:$0xff]  ;;  %v55_v18 = vld [vmem:[#allocation5 + $0x58] sm:$0xff]  ;;  %v56_v20 = vld [vmem:[#allocation5 + $0x60] sm:$0xff] }
  0x2e   :  { %213 = vmatprep.subr.bf16.mxu0 %v322_v0  ;;  %v226_v19 = vpack.c.bf16 %v55_v18, %v54_v17  ;;  %v57_v21 = vld [vmem:[#allocation5 + $0x68] sm:$0xff]  ;;  %v58_v23 = vld [vmem:[#allocation5 + $0x70] sm:$0xff]  ;;  %v59_v24 = vld [vmem:[#allocation5 + $0x78] sm:$0xff] }
  0x2f   :  { %v229_v22 = vpack.c.bf16 %v57_v21, %v56_v20  ;;  %v232_v25 = vpack.c.bf16 %v59_v24, %v58_v23  ;;  %v43_v26 = vld [vmem:[#allocation2] sm:$0xff] }
  0x30   :  { %v157_v27 = vld [vmem:[%s393_s2] ss:$0 sm:$0xff] }
  0x31   :  { %215 = vmatpush3.bf16.msra.mxu0 %v214_v7 }
  0x32   :  { %216 = vmatprep.subr.bf16.mxu0 %v322_v0 }
  0x35   :  { %218 = vmatpush3.bf16.msra.mxu0 %v217_v10 }
  0x36   :  { %219 = vmatprep.subr.bf16.mxu0 %v322_v0 }
  0x39   :  { %221 = vmatpush3.bf16.msra.mxu0 %v220_v13 }
  0x3a   :  { %222 = vmatprep.subr.bf16.mxu0 %v322_v0 }
  0x3d   :  { %224 = vmatpush3.bf16.msra.mxu0 %v223_v16 }
  0x3e   :  { %225 = vmatprep.subr.bf16.mxu0 %v322_v0 }
  0x41   :  { %227 = vmatpush3.bf16.msra.mxu0 %v226_v19 }
  0x42   :  { %228 = vmatprep.subr.bf16.mxu0 %v322_v0 }
  0x45   :  { %230 = vmatpush3.bf16.msra.mxu0 %v229_v22 }
  0x46   :  { %231 = vmatprep.subr.bf16.mxu0 %v322_v0 }
  0x49   :  { %233 = vmatpush3.bf16.msra.mxu0 %v232_v25 }
  0x4c   :  { %208 = vmatmul.mubr.f32.vlgmr.msra.gmra.mrb[0].mxu0 %v43_v26 }
 0x11f   :  { %v133_v28 = vpop.f32.mrb[0].mxu0 }
 0x120   :  { %v134_v29 = vadd.f32 %v157_v27, %v133_v28  ;;  %v209_v30 = vpop.f32.mrb[1].mxu0 }
 0x122   :  { %v137_v31 = vmax.f32 %v134_v29, 0.0 }
 0x124   :  { %138 = vst [vmem:[#allocation7] sm:$0xff] %v137_v31 }
 0x125   :  { %143 = vsyncadd [#allocation4], 96  ;;  %s325_s14 = smov [#allocation7]  }
 0x126   :  { %s144_s15 = sshll.u32 %s325_s14, 4  ;;  %s145_s15 = int_to_ptr.vmem [resolvable:$true] %s144_s15 }
 0x127   :  { %s288_s16 = scalar_lea.vmem %s145_s15, 32  ;;  %s292_s17 = scalar_lea.vmem %s145_s15, 128 }
 0x128   :  { %p289_p2 = scmp.ne.s32.totalorder %s145_s15, %s288_s16  ;;  %p293_p3 = scmp.lt.s32.totalorder %s145_s15, %s145_s15 }
 0x129   :  { %p294_p4 = scmp.lt.s32.totalorder %s292_s17, %s288_s16 }
 0x12b   :  { %p295_p5 = por %p294_p4, %p293_p3 }
 0x12d   :  { %p296_p6 = pnand %p295_p5, %p289_p2 }
 0x12f   :  { %299 = shalt.err (!%p296_p6)
}
 0x130   :  { %s300_s2 = scalar_lea.hbm %s394_s3, 32 }
 0x131   :  { %p301_p7 = scmp.ne.s32.totalorder %s394_s3, %s300_s2  ;;  %p304_p8 = scmp.lt.u32.totalorder %s300_s2, %s394_s3 }
 0x133   :  { %p306_p9 = pnand %p304_p8, %p301_p7 }
 0x135   :  { %309 = shalt.err (!%p306_p9)
}
 0x136   :  { %150 = dma.vmem_to_hbm [thread:$0]  %s145_s15, 32, %s394_s3, [#allocation4], %s317_s23, %s317_s23, %s318_s24  }
 0x137   :  { %314 = dma.done.wait [#allocation4], 128  }
 0x138   :  { %315 = vsyncadd [#allocation4], 4294967168 }
 0x139   :  { %154 = vsyncpa [#allocation3], 1 }
 0x13a   :  { %155 = vsyncpa [#allocation6], 1 }
 0x13b   :  { %156 = vsyncpa [#allocation4], 1 }

</bundles_post_ra>
